<compile_context>
chip_gen: v7x
topology: tpu7x:2x2x1
jax: 0.10.0
libtpu: 0.0.40
codegen_flags: <defaults>
</compile_context>

<pallas_src>
import jax
import jax.numpy as jnp
from jax.experimental import pallas as pl
from jax.experimental.pallas import tpu as pltpu

KS = 31          # location conv kernel size
PAD = (KS - 1) // 2

ATTN_DIM = 128   # attention hidden dim
QUERY_DIM = 1024
MEM_DIM = 512
LOC_CH = 32      # location conv output channels
CAT_CH = 2       # location conv input channels

NEG_BIG = -1e30  # additive mask bias (stands in for -inf)


def attention_kernel(pq_ref, mem_ref, pmem_ref, xcol_ref, bias_ref,
                     weff_ref, wv_ref, ctx_ref, attn_ref):
    nb = pq_ref.shape[0]                       # static batch-block size
    w_eff = weff_ref[...]                      # (128, 62)  bf16  fused conv+dense weight
    wv = wv_ref[...]                           # (128, 1)   f32

    # Static unroll over the NB batch rows of this block.
    for n in range(nb):
        pq = pq_ref[n]                         # (128, 1)   f32   processed query (wrapper)
        bias = bias_ref[n]                     # (1, Tp)    f32   additive mask bias

        # location path: single MXU dot (128,62)@(62,Tp) replaces conv + dense
        pattn_t = jnp.dot(w_eff, xcol_ref[n], preferred_element_type=jnp.float32)

        # energies = v . tanh(pq + processed_memory + processed_attention)   (f32)
        e = jnp.tanh(pq + pmem_ref[n].astype(jnp.float32) + pattn_t)      # (128, Tp)
        # rank-1 reduction on VPU + XLU instead of an M=1 MXU matmul
        energies = jnp.sum(e * wv, axis=0, keepdims=True)                 # (1, Tp)

        # masked softmax over T (mask and T-padding folded into the additive bias)
        align = energies + bias
        m = jnp.max(align, axis=-1, keepdims=True)
        p = jnp.exp(align - m)
        w = p / jnp.sum(p, axis=-1, keepdims=True)      # exact normalisation (f32)

        # attention context: (1,Tp)@(Tp,512); padded rows of memory are zero
        ctx = jnp.dot(w.astype(jnp.bfloat16), mem_ref[n],
                      preferred_element_type=jnp.float32)                 # (1, 512)

        ctx_ref[n] = ctx
        attn_ref[n] = w


def attention_forward(params, attention_hidden_state, memory, processed_memory,
                      attention_weights_cat, mask, *, batch_block=None):
    """Pallas version of Attention.forward."""
    B, T, _ = memory.shape
    Tp = ((T + 127) // 128) * 128              # lane-dense T
    HI = jax.lax.Precision.HIGHEST

    wq = params["wq"]            # (128, 1024)
    conv_w = params["conv_w"]    # (32, 2, 31)
    wd = params["wd"]            # (128, 32)
    wv = params["wv"]            # (1, 128)

    # ---- wrapper-side prep (constant per utterance in a real decode loop) --------------
    # query projection hoisted out of the kernel: (B,1024)@(1024,128) -> (B,128,1)
    pq = jnp.dot(attention_hidden_state, wq.T, precision=HI)
    pq = pq.reshape(B, ATTN_DIM, 1).astype(jnp.float32)

    # fold location conv (im2col form) and location dense into one (128, 62) weight
    wcol = jnp.transpose(conv_w, (0, 2, 1)).reshape(LOC_CH, CAT_CH * KS)   # (32, 62)
    w_eff = jnp.dot(wd, wcol, precision=HI).astype(jnp.bfloat16)           # (128, 62)
    wv_col = wv.reshape(ATTN_DIM, 1).astype(jnp.float32)

    # im2col of attention_weights_cat, zero-padded to Tp: (B, 62, Tp)
    awc_full = jnp.pad(attention_weights_cat,
                       ((0, 0), (0, 0), (PAD, PAD + Tp - T)))              # (B, 2, Tp+30)
    xcol = jnp.concatenate([awc_full[:, :, k:k + Tp] for k in range(KS)], axis=1)
    # TODO(synk): for very long T, build the 31 taps in-kernel with pltpu.roll instead of
    # materialising the (B, 62, Tp) im2col in HBM.

    memory_p = jnp.pad(memory, ((0, 0), (0, Tp - T), (0, 0)))              # (B, Tp, 512)
    pmem_t = jnp.transpose(
        jnp.pad(processed_memory, ((0, 0), (0, Tp - T), (0, 0))), (0, 2, 1))  # (B, 128, Tp)

    full_mask = jnp.pad(mask, ((0, 0), (0, Tp - T)), constant_values=True)
    bias = jnp.where(full_mask, NEG_BIG, 0.0).astype(jnp.float32).reshape(B, 1, Tp)

    # big operands stored bf16 (halves HBM traffic); all accumulation stays f32 in-kernel
    memory_b = memory_p.astype(jnp.bfloat16)
    pmem_b = pmem_t.astype(jnp.bfloat16)
    xcol_b = xcol.astype(jnp.bfloat16)

    # ---- batch blocking -----------------------------------------------------------------
    # input DMA bytes per batch row per grid step (bf16 big operands + f32 bias/pq)
    per_batch_bytes = Tp * (MEM_DIM * 2 + ATTN_DIM * 2 + CAT_CH * KS * 2 + 4) + ATTN_DIM * 4
    if batch_block is None:
        target = 1 << 20                              # aim for ~1 MiB of input per step
        nb = max(1, target // max(per_batch_bytes, 1))
        if B >= 2:                                    # keep >=2 steps so v7x can split TCs
            nb = min(nb, (B + 1) // 2)
        batch_block = nb
    NB = int(max(1, min(batch_block, B)))
    Bp = -(-B // NB) * NB
    if Bp != B:
        pb = ((0, Bp - B), (0, 0), (0, 0))
        pq = jnp.pad(pq, pb)
        memory_b = jnp.pad(memory_b, pb)
        pmem_b = jnp.pad(pmem_b, pb)
        xcol_b = jnp.pad(xcol_b, pb)
        bias = jnp.pad(bias, pb)
    num_steps = Bp // NB

    # explicit VMEM budget: double-buffered in/out blocks + weights + headroom.
    # TODO(synk): for memories with Tp in the several-thousands switch to a T-tiled
    # online-softmax kernel instead of raising this (v7x has only 64 MiB physical VMEM,
    # v5e's default scoped limit is 16 MiB).
    out_bytes = NB * (MEM_DIM * 4 + Tp * 4)
    step_bytes = NB * per_batch_bytes + out_bytes
    weight_bytes = ATTN_DIM * CAT_CH * KS * 2 + ATTN_DIM * 4
    vmem_limit = int(min(64 << 20, max(32 << 20, 2 * step_bytes + weight_bytes + (4 << 20))))

    ctx, attn = pl.pallas_call(
        attention_kernel,
        out_shape=(jax.ShapeDtypeStruct((Bp, 1, MEM_DIM), jnp.float32),
                   jax.ShapeDtypeStruct((Bp, 1, Tp), jnp.float32)),
        grid_spec=pltpu.PrefetchScalarGridSpec(
            num_scalar_prefetch=0,
            grid=(num_steps,),
            in_specs=[
                pl.BlockSpec((NB, ATTN_DIM, 1), lambda b: (b, 0, 0)),      # processed query
                pl.BlockSpec((NB, Tp, MEM_DIM), lambda b: (b, 0, 0)),      # memory (bf16)
                pl.BlockSpec((NB, ATTN_DIM, Tp), lambda b: (b, 0, 0)),     # processed mem^T (bf16)
                pl.BlockSpec((NB, CAT_CH * KS, Tp), lambda b: (b, 0, 0)),  # im2col (bf16)
                pl.BlockSpec((NB, 1, Tp), lambda b: (b, 0, 0)),            # additive mask bias
                pl.BlockSpec((ATTN_DIM, CAT_CH * KS), lambda b: (0, 0)),   # fused location weight
                pl.BlockSpec((ATTN_DIM, 1), lambda b: (0, 0)),             # v (column)
            ],
            out_specs=[
                pl.BlockSpec((NB, 1, MEM_DIM), lambda b: (b, 0, 0)),
                pl.BlockSpec((NB, 1, Tp), lambda b: (b, 0, 0)),
            ],
        ),
        compiler_params=pltpu.CompilerParams(
            dimension_semantics=("parallel",),
            vmem_limit_bytes=vmem_limit),
    )(pq, memory_b, pmem_b, xcol_b, bias, w_eff, wv_col)

    return ctx.reshape(Bp, MEM_DIM)[:B], attn.reshape(Bp, Tp)[:B, :T]


def attention_reference(params, q, memory, pmem, awc, mask):
    """Pure-JAX reference of the PyTorch forward (f32, highest matmul precision)."""
    HI = jax.lax.Precision.HIGHEST
    wq, conv_w, wd, wv = params["wq"], params["conv_w"], params["wd"], params["wv"]
    pq = jnp.dot(q, wq.T, precision=HI)[:, None, :]                        # (B,1,128)
    conv_out = jax.lax.conv_general_dilated(
        awc, conv_w, window_strides=(1,), padding=[(PAD, PAD)],
        dimension_numbers=("NCH", "OIH", "NCH"), precision=HI)             # (B,32,T)
    loc = jnp.einsum("bct,dc->btd", conv_out, wd, precision=HI)            # (B,T,128)
    energies = jnp.einsum("btd,d->bt", jnp.tanh(pq + pmem + loc), wv[0], precision=HI)
    align = jnp.where(mask, -jnp.inf, energies)
    w = jax.nn.softmax(align, axis=1)
    ctx = jnp.einsum("bt,btd->bd", w, memory, precision=HI)
    return ctx, w


if __name__ == "__main__":
    key = jax.random.PRNGKey(0)
    ks = jax.random.split(key, 8)
    B, T = 2, 64

    def xavier(k, shape, fan_in, fan_out, gain=1.0):
        limit = gain * (6.0 / (fan_in + fan_out)) ** 0.5
        return jax.random.uniform(k, shape, jnp.float32, -limit, limit)

    params = {
        "wq": xavier(ks[0], (ATTN_DIM, QUERY_DIM), QUERY_DIM, ATTN_DIM, 5.0 / 3.0),
        "conv_w": xavier(ks[1], (LOC_CH, CAT_CH, KS), CAT_CH * KS, LOC_CH),
        "wd": xavier(ks[2], (ATTN_DIM, LOC_CH), LOC_CH, ATTN_DIM, 5.0 / 3.0),
        "wv": xavier(ks[3], (1, ATTN_DIM), ATTN_DIM, 1),
    }

    attention_hidden_state = jax.random.normal(ks[4], (B, QUERY_DIM), jnp.float32)
    memory = jax.random.normal(ks[5], (B, T, MEM_DIM), jnp.float32)
    processed_memory = jax.random.normal(ks[6], (B, T, ATTN_DIM), jnp.float32)
    attention_weights_cat = jax.random.uniform(ks[7], (B, CAT_CH, T), jnp.float32)
    lengths = jnp.array([T, T - 16])
    mask = jnp.arange(T)[None, :] >= lengths[:, None]                      # (B,T), True=masked

    ctx, attn = attention_forward(params, attention_hidden_state, memory,
                                  processed_memory, attention_weights_cat, mask)
    jax.block_until_ready((ctx, attn))

    ctx_r, attn_r = attention_reference(params, attention_hidden_state, memory,
                                        processed_memory, attention_weights_cat, mask)
    # Tolerances account for bf16 storage of memory / processed_memory / im2col
    # (2^-9 per-element rounding) vs the f32 HIGHEST-precision reference; a real logic
    # bug (shifted conv tap, wrong mask, bad layout) produces errors >> 1e-2.
    assert jnp.allclose(ctx, ctx_r, rtol=1e-2, atol=1e-2), "context mismatch"
    assert jnp.allclose(attn, attn_r, rtol=1e-2, atol=1e-2), "weights mismatch"
    print("KERNEL_OK")
</pallas_src>

<mosaic_0001>
module attributes {stable_mosaic.version = 11 : i64} {
  func.func @attention_kernel(%arg0: i32, %arg1: memref<1x128x1xf32, #tpu.memory_space<vmem>>, %arg2: memref<1x128x512xbf16, #tpu.memory_space<vmem>>, %arg3: memref<1x128x128xbf16, #tpu.memory_space<vmem>>, %arg4: memref<1x62x128xbf16, #tpu.memory_space<vmem>>, %arg5: memref<1x1x128xf32, #tpu.memory_space<vmem>>, %arg6: memref<128x62xbf16, #tpu.memory_space<vmem>>, %arg7: memref<128x1xf32, #tpu.memory_space<vmem>>, %arg8: memref<1x1x512xf32, #tpu.memory_space<vmem>>, %arg9: memref<1x1x128xf32, #tpu.memory_space<vmem>>) attributes {dimension_semantics = [#tpu.dimension_semantics<parallel>], iteration_bounds = array<i64: 2>, scalar_prefetch = 0 : i64, scratch_operands = 0 : i64, tpu.core_type = #tpu.core_type<tc>, window_params = [{transform_indices = @transform_0, window_bounds = array<i64: 1, 128, 1>}, {transform_indices = @transform_1, window_bounds = array<i64: 1, 128, 512>}, {transform_indices = @transform_2, window_bounds = array<i64: 1, 128, 128>}, {transform_indices = @transform_3, window_bounds = array<i64: 1, 62, 128>}, {transform_indices = @transform_4, window_bounds = array<i64: 1, 1, 128>}, {pipeline_mode = #tpu.pipeline_mode<synchronous>, transform_indices = @transform_5, window_bounds = array<i64: 128, 62>}, {pipeline_mode = #tpu.pipeline_mode<synchronous>, transform_indices = @transform_6, window_bounds = array<i64: 128, 1>}, {transform_indices = @transform_7, window_bounds = array<i64: 1, 1, 512>}, {transform_indices = @transform_8, window_bounds = array<i64: 1, 1, 128>}]} {
    %c0 = arith.constant 0 : index
    %c0_0 = arith.constant 0 : index
    %0 = vector.load %arg6[%c0, %c0_0] : memref<128x62xbf16, #tpu.memory_space<vmem>>, vector<128x62xbf16>
    %c0_1 = arith.constant 0 : index
    %c0_2 = arith.constant 0 : index
    %1 = vector.load %arg7[%c0_1, %c0_2] : memref<128x1xf32, #tpu.memory_space<vmem>>, vector<128x1xf32>
    %c0_3 = arith.constant 0 : index
    %c0_4 = arith.constant 0 : index
    %c0_5 = arith.constant 0 : index
    %2 = vector.load %arg1[%c0_3, %c0_4, %c0_5] : memref<1x128x1xf32, #tpu.memory_space<vmem>>, vector<1x128x1xf32>
    %3 = vector.shape_cast %2 : vector<1x128x1xf32> to vector<128x1xf32>
    %c0_6 = arith.constant 0 : index
    %c0_7 = arith.constant 0 : index
    %c0_8 = arith.constant 0 : index
    %4 = vector.load %arg5[%c0_6, %c0_7, %c0_8] : memref<1x1x128xf32, #tpu.memory_space<vmem>>, vector<1x1x128xf32>
    %5 = vector.shape_cast %4 : vector<1x1x128xf32> to vector<1x128xf32>
    %c0_9 = arith.constant 0 : index
    %c0_10 = arith.constant 0 : index
    %c0_11 = arith.constant 0 : index
    %6 = vector.load %arg4[%c0_9, %c0_10, %c0_11] : memref<1x62x128xbf16, #tpu.memory_space<vmem>>, vector<1x62x128xbf16>
    %7 = vector.shape_cast %6 : vector<1x62x128xbf16> to vector<62x128xbf16>
    %cst = arith.constant dense<0.000000e+00> : vector<128x128xf32>
    %8 = tpu.matmul %0, %7, %cst {dimension_numbers = #tpu.dot_dimension_numbers<[1], [0], [0], [1], [0, 0, 1, 1], [], []>} : vector<128x62xbf16>, vector<62x128xbf16>, vector<128x128xf32> -> vector<128x128xf32>
    %c0_12 = arith.constant 0 : index
    %c0_13 = arith.constant 0 : index
    %c0_14 = arith.constant 0 : index
    %9 = vector.load %arg3[%c0_12, %c0_13, %c0_14] : memref<1x128x128xbf16, #tpu.memory_space<vmem>>, vector<1x128x128xbf16>
    %10 = vector.shape_cast %9 : vector<1x128x128xbf16> to vector<128x128xbf16>
    %11 = arith.extf %10 : vector<128x128xbf16> to vector<128x128xf32>
    %12 = vector.broadcast %3 : vector<128x1xf32> to vector<128x128xf32>
    %13 = arith.addf %12, %11 : vector<128x128xf32>
    %14 = arith.addf %13, %8 : vector<128x128xf32>
    %15 = math.tanh %14 : vector<128x128xf32>
    %16 = vector.broadcast %1 : vector<128x1xf32> to vector<128x128xf32>
    %17 = arith.mulf %15, %16 : vector<128x128xf32>
    %cst_15 = arith.constant dense<0.000000e+00> : vector<128xf32>
    %18 = vector.multi_reduction <add>, %17, %cst_15 [0] : vector<128x128xf32> to vector<128xf32>
    %19 = vector.shape_cast %18 : vector<128xf32> to vector<1x128xf32>
    %20 = arith.addf %19, %5 : vector<1x128xf32>
    %cst_16 = arith.constant dense<0xFF800000> : vector<1xf32>
    %21 = vector.multi_reduction <maximumf>, %20, %cst_16 [1] : vector<1x128xf32> to vector<1xf32>
    %22 = vector.shape_cast %21 : vector<1xf32> to vector<1x1xf32>
    %23 = vector.broadcast %22 : vector<1x1xf32> to vector<1x128xf32>
    %24 = arith.subf %20, %23 : vector<1x128xf32>
    %25 = math.exp %24 : vector<1x128xf32>
    %cst_17 = arith.constant dense<0.000000e+00> : vector<1xf32>
    %26 = vector.multi_reduction <add>, %25, %cst_17 [1] : vector<1x128xf32> to vector<1xf32>
    %27 = vector.shape_cast %26 : vector<1xf32> to vector<1x1xf32>
    %28 = vector.broadcast %27 : vector<1x1xf32> to vector<1x128xf32>
    %29 = arith.divf %25, %28 : vector<1x128xf32>
    %30 = arith.truncf %29 : vector<1x128xf32> to vector<1x128xbf16>
    %c0_18 = arith.constant 0 : index
    %c0_19 = arith.constant 0 : index
    %c0_20 = arith.constant 0 : index
    %31 = vector.load %arg2[%c0_18, %c0_19, %c0_20] : memref<1x128x512xbf16, #tpu.memory_space<vmem>>, vector<1x128x512xbf16>
    %32 = vector.shape_cast %31 : vector<1x128x512xbf16> to vector<128x512xbf16>
    %cst_21 = arith.constant dense<0.000000e+00> : vector<1x512xf32>
    %33 = tpu.matmul %30, %32, %cst_21 {dimension_numbers = #tpu.dot_dimension_numbers<[1], [0], [0], [1], [0, 0, 1, 1], [], []>} : vector<1x128xbf16>, vector<128x512xbf16>, vector<1x512xf32> -> vector<1x512xf32>
    %c0_22 = arith.constant 0 : index
    %c0_23 = arith.constant 0 : index
    %c0_24 = arith.constant 0 : index
    %34 = vector.load %arg8[%c0_22, %c0_23, %c0_24] : memref<1x1x512xf32, #tpu.memory_space<vmem>>, vector<1x1x512xf32>
    %35 = vector.shape_cast %34 : vector<1x1x512xf32> to vector<1x512xf32>
    %36 = vector.shape_cast %33 : vector<1x512xf32> to vector<1x1x512xf32>
    tpu.vector_store %arg8[%c0_22, %c0_23, %c0_24], %36 {strides = array<i32>} : memref<1x1x512xf32, #tpu.memory_space<vmem>>, vector<1x1x512xf32>,
    %c0_25 = arith.constant 0 : index
    %c0_26 = arith.constant 0 : index
    %c0_27 = arith.constant 0 : index
    %37 = vector.load %arg9[%c0_25, %c0_26, %c0_27] : memref<1x1x128xf32, #tpu.memory_space<vmem>>, vector<1x1x128xf32>
    %38 = vector.shape_cast %37 : vector<1x1x128xf32> to vector<1x128xf32>
    %39 = vector.shape_cast %29 : vector<1x128xf32> to vector<1x1x128xf32>
    tpu.vector_store %arg9[%c0_25, %c0_26, %c0_27], %39 {strides = array<i32>} : memref<1x1x128xf32, #tpu.memory_space<vmem>>, vector<1x1x128xf32>,
    return
  }
  func.func @transform_0(%arg0: i32) -> (i32, i32, i32) {
    %c0_i32 = arith.constant 0 : i32
    %c0_i32_0 = arith.constant 0 : i32
    %c0_i32_1 = arith.constant 0 : i32
    return %arg0, %c0_i32, %c0_i32_0 : i32, i32, i32
  }
  func.func @transform_1(%arg0: i32) -> (i32, i32, i32) {
    %c0_i32 = arith.constant 0 : i32
    %c0_i32_0 = arith.constant 0 : i32
    %c0_i32_1 = arith.constant 0 : i32
    return %arg0, %c0_i32, %c0_i32_0 : i32, i32, i32
  }
  func.func @transform_2(%arg0: i32) -> (i32, i32, i32) {
    %c0_i32 = arith.constant 0 : i32
    %c0_i32_0 = arith.constant 0 : i32
    %c0_i32_1 = arith.constant 0 : i32
    return %arg0, %c0_i32, %c0_i32_0 : i32, i32, i32
  }
  func.func @transform_3(%arg0: i32) -> (i32, i32, i32) {
    %c0_i32 = arith.constant 0 : i32
    %c0_i32_0 = arith.constant 0 : i32
    %c0_i32_1 = arith.constant 0 : i32
    return %arg0, %c0_i32, %c0_i32_0 : i32, i32, i32
  }
  func.func @transform_4(%arg0: i32) -> (i32, i32, i32) {
    %c0_i32 = arith.constant 0 : i32
    %c0_i32_0 = arith.constant 0 : i32
    %c0_i32_1 = arith.constant 0 : i32
    return %arg0, %c0_i32, %c0_i32_0 : i32, i32, i32
  }
  func.func @transform_5(%arg0: i32) -> (i32, i32) {
    %c0_i32 = arith.constant 0 : i32
    %c0_i32_0 = arith.constant 0 : i32
    %c0_i32_1 = arith.constant 0 : i32
    return %c0_i32, %c0_i32_0 : i32, i32
  }
  func.func @transform_6(%arg0: i32) -> (i32, i32) {
    %c0_i32 = arith.constant 0 : i32
    %c0_i32_0 = arith.constant 0 : i32
    %c0_i32_1 = arith.constant 0 : i32
    return %c0_i32, %c0_i32_0 : i32, i32
  }
  func.func @transform_7(%arg0: i32) -> (i32, i32, i32) {
    %c0_i32 = arith.constant 0 : i32
    %c0_i32_0 = arith.constant 0 : i32
    %c0_i32_1 = arith.constant 0 : i32
    return %arg0, %c0_i32, %c0_i32_0 : i32, i32, i32
  }
  func.func @transform_8(%arg0: i32) -> (i32, i32, i32) {
    %c0_i32 = arith.constant 0 : i32
    %c0_i32_0 = arith.constant 0 : i32
    %c0_i32_1 = arith.constant 0 : i32
    return %arg0, %c0_i32, %c0_i32_0 : i32, i32, i32
  }
}

</mosaic_0001>

<bundles_post_ra>
// kernel: tpu_custom_call.1
= control target key start
LH: loop header
LB: loop body
LE: loop exit
PB: predicated region body
PF: predicated region fallthrough
CT: control target
= control target key end

     0   :  { %s2309_s0 = inlined_call_operand.vmem [shape: f32[2,128,1], index: 0, kind: input, shape index: {}]   ;;  %s2310_s1 = inlined_call_operand.vmem [shape: bf16[2,128,512], index: 1, kind: input, shape index: {}]   ;;  %s2311_s2 = inlined_call_operand.hbm [shape: bf16[2,128,128], index: 2, kind: input, shape index: {}]   ;;  %s2312_s3 = inlined_call_operand.vmem [shape: bf16[2,62,128], index: 3, kind: input, shape index: {}]   ;;  %s2313_s4 = inlined_call_operand.vmem [shape: f32[2,1,128], index: 4, kind: input, shape index: {}]   ;;  %s2314_s5 = inlined_call_operand.vmem [shape: bf16[128,62], index: 5, kind: input, shape index: {}]   ;;  %s2315_s6 = inlined_call_operand.vmem [shape: f32[128,1], index: 6, kind: input, shape index: {}]   ;;  %s2316_s7 = inlined_call_operand.hbm [shape: f32[2,1,512], index: 7, kind: output, shape index: {0}]   ;;  %s2317_s8 = inlined_call_operand.hbm [shape: f32[2,1,128], index: 8, kind: output, shape index: {1}]  }
   0x1   :  { %2319 = sst [smem:[#allocation11_spill]] %s2309_s0 }
   0x2   :  { %2320 = sst [smem:[#allocation12_spill]] %s2311_s2 }
   0x3   :  { %2321 = sst [smem:[#allocation13_spill]] %s2312_s3 }
   0x4   :  { %14 = vsyncpa [#allocation3], 0 }
   0x5   :  { %16 = vsyncpa [#allocation3 + $0x1], 0 }
   0x6   :  { %17 = vsyncpa [#allocation4], 0 }
   0x7   :  { %19 = vsyncpa [#allocation4 + $0x1], 0 }
   0x8   :  { %20 = vsyncpa [#allocation7], 0 }
   0x9   :  { %22 = vsyncpa [#allocation7 + $0x1], 0  ;;  %s1919_s27 = smov 0   ;;  %s1921_s28 = smov 0  }
   0xa   :  { %s1923_s29 = smov 0   ;;  %s1925_s30 = smov 0  }
   0xb LB: > { %s1940_s9 = sadd.s32 4294967295, %s1865_s30   ;;  %s1430_s10 = sadd.s32 4294967294, %s1865_s30   ;;  %s1865_s30 = sphi %s1925_s30, %s2336_s30   ;;  %s1861_s29 = sphi %s1923_s29, %s2335_s29   ;;  %s1857_s28 = sphi %s1921_s28, %s2334_s28   ;;  %s1853_s27 = sphi %s1919_s27, %s2333_s27  }
   0xc   : > { %s1944_s11 = sadd.s32 1, %s1865_s30   ;;  %s87_s12 = sadd.s32 1, %s1861_s29 }
   0xd   : > { %s84_s13 = ssub.s32 %s1865_s30, %s1944_s11  ;;  %p94_p0 = scmp.ne.s32.totalorder %s1861_s29, %s1857_s28 }
   0xe   : > { %p85_p1 = scmp.eq.s32.totalorder %s84_s13, 0  ;;  %p95_p2 = scmp.eq.s32.totalorder %s1865_s30, 0 }
   0xf   : > { %p100_p3 = scmp.ne.s32.totalorder %s1857_s28, %s1853_s27  ;;  %p101_p4 = scmp.eq.s32.totalorder %s1940_s9, 0 }
  0x10   : > { %s1956_s14 = scalar_select %p85_p1, %s1861_s29, %s87_s12  }
  0x11   : > { %p1958_p5 = por %p95_p2, %p94_p0  ;;  %p1962_p6 = por %p101_p4, %p100_p3 }
  0x12   : > { %p218_p7 = scmp.eq.s32.totalorder %s1940_s9, 1  ;;  %p224_p8 = scmp.eq.s32.totalorder %s1430_s10, 1 }
  0x13   : > { %p1601_p10 = scmp.lt.s32.totalorder %s1865_s30, 2  ;;  %s292_s19 = sand.u32 1, %s1861_s29  }
  0x14   : > { %p1969_p11 = por %p218_p7, %p94_p0  ;;  %p1973_p12 = por %p224_p8, %p100_p3 }
  0x15   : > { %s1503_s20 = sshll.u32 %s1865_s30, 10  ;;  %s1433_s21 = sshll.u32 %s292_s19, 6 }
  0x16   : > { %s2324_s17 = scalar_select %p1969_p11, 1, 0 }
  0x17   : > { %s2325_s18 = scalar_select %p1973_p12, 1, 0 }
  0x18   : > { %s2326_s2 = sld [smem:[#allocation12_spill]]  ;;  %s296_s25 = scalar_lea.vmem [#allocation2], %s1433_s21 }
  0x19   : > { %s303_s26 = sshll.u32 %s296_s25, 4  ;;  %p1986_p13 = pnand %p1601_p10, %p1958_p5  ;;  %s1990_s26 = int_to_ptr.vmem [resolvable:$true] %s303_s26 }
  0x1a   : > { %s1992_s12 = scalar_lea.sflag [#allocation3], %s292_s19 }
  0x1b   : > { %p1739_p1 = pneg %p1986_p13 }
  0x1e   : > { %s1982_s24 = scalar_lea.hbm %s2326_s2, %s1503_s20  ;;  %s1742_s21 = scalar_lea.hbm %s2326_s2, 2048 }
  0x1f   : > { %s1737_s13 = scalar_lea.hbm %s1982_s24, 1024  ;;  %p1743_p4 = scmp.lt.u32.totalorder %s1982_s24, %s2326_s2 }
  0x20   : > { %p1738_p0 = scmp.ne.s32.totalorder %s1982_s24, %s1737_s13  ;;  %p1744_p5 = scmp.lt.u32.totalorder %s1742_s21, %s1737_s13 }
  0x21   : > { %p1746_p8 = scmp.lt.u32.totalorder %s1737_s13, %s1982_s24 }
  0x22   : > { %p1740_p2 = pnand %p1739_p1, %p1738_p0  ;;  %p1745_p7 = por %p1744_p5, %p1743_p4 }
  0x24   : > { %p1741_p3 = pneg %p1740_p2  ;;  %p1747_p10 = por %p1746_p8, %p1745_p7 }
  0x26   : > { %p1748_p9 = pnand %p1747_p10, %p1741_p3 }
  0x28   : > { %1751 = shalt.err (!%p1748_p9)
}
  0x29   : > { %s1752_s19 = scalar_lea.vmem %s1990_s26, 1024  ;;  %s1867_s25 = smov [#allocation2]  }
  0x2a   : > { %p1753_p0 = scmp.ne.s32.totalorder %s1990_s26, %s1752_s19  ;;  %s1757_s20 = sshll.u32 %s1867_s25, 4  ;;  %s1758_s20 = int_to_ptr.vmem [resolvable:$false] %s1757_s20 }
  0x2b   : > { %s1759_s15 = scalar_lea.vmem %s1758_s20, 2048  ;;  %p1760_p11 = scmp.lt.s32.totalorder %s1990_s26, %s1758_s20 }
  0x2c   : > { %p1755_p2 = pnand %p1753_p0, %p1739_p1  ;;  %p1761_p4 = scmp.lt.s32.totalorder %s1759_s15, %s1752_s19 }
  0x2e   : > { %p1756_p12 = pneg %p1755_p2  ;;  %p1762_p5 = por %p1761_p4, %p1760_p11 }
  0x30   : > { %p1763_p7 = pnand %p1762_p5, %p1756_p12 }
  0x32   : > { %1766 = shalt.err (!%p1763_p7)
}
  0x33   : > { %s1868_s13 = smov 64   ;;  %s1869_s21 = smov 4  }
  0x34   : > { %1593 = dma.hbm_to_vmem [thread:$0]  (!%p1986_p13), %s1982_s24, 1024, %s1990_s26, %s1992_s12, %s1868_s13, %s1868_s13, %s1869_s21  }
  0x35   : > { %p1436_p9 = scmp.ge.s32.totalorder %s1865_s30, 1  ;;  %p325_p1 = scmp.lt.s32.totalorder %s1865_s30, 3 }
  0x37   : > { %p326_p3 = pnand %p1436_p9, %p325_p1 }
  0x38   : > { %s2023_s22 = sand.u32 (!%p326_p3), 1, %s1857_s28  }
  0x39   : > { %329 = sbr.rel (%p326_p3) target bundleno = 914 (0x392), region = 48  ;;  %s1437_s23 = sshll.u32 (!%p326_p3), %s2023_s22, 6 }
  0x3a   : > { %s332_s19 = scalar_lea.sflag (!%p326_p3), [#allocation3], %s2023_s22  ;;  %s2027_s25 = scalar_lea.vmem (!%p326_p3), [#allocation2], %s1437_s23 }
  0x40   : > { %1840 = dma.done.wait (%p1962_p6), %s332_s19, 1024  }
  0x41   : > { %1842 = vsyncadd (%p1962_p6), %s332_s19, 4294966272  ;;  %p390_p11 = scmp.lt.s32.totalorder %s1940_s9, 1  ;;  %v1870_v0 = vmov 0   ;;  %vm529_vm0 = vcmask 506880   ;;  %s2328_s3 = sld [smem:[#allocation13_spill]]  ;;  %v1645_v1 = vld [vmem:[%s2314_s5] sm:$0xff]  }
  0x42   : > { %1639 = vset.pattern.permute.xlu0 %v1870_v0  ;;  %1640 = vset.pattern.permute.xlu1 %v1870_v0  ;;  %s2329_s0 = sld [smem:[#allocation11_spill]]  ;;  %vm554_vm1 = vcmask 1046528   ;;  %v1646_v13 = vld [vmem:[%s2314_s5 + $0x8] sm:$0xff]   ;;  %v1647_v14 = vld [vmem:[%s2314_s5 + $0x10] sm:$0xff]   ;;  %v425_v18 = vld [vmem:[%s2315_s6] sm:$0xff]  ;;  %vm933_vm2 = vcmask 1040384  }
  0x43   : > { %s2037_s24 = scalar_select %p390_p11, %s1940_s9, 1  ;;  %1170 = vmatprep.mubr.bf16.mxu1 %v1870_v0  ;;  %1567 = vmatprep.mubr.msk.bf16.mxu0 %vm529_vm0, %v1645_v1  ;;  %v1648_v19 = vld [vmem:[%s2314_s5 + $0x18] sm:$0xff]   ;;  %v1649_v20 = vld [vmem:[%s2314_s5 + $0x20] sm:$0xff]   ;;  %v426_v21 = vld [vmem:[%s2315_s6 + $0x8] sm:$0xff] }
  0x44   : > { %v427_v23 = vld [vmem:[%s2315_s6 + $0x10] sm:$0xff]  ;;  %v1650_v25 = vld [vmem:[%s2314_s5 + $0x28] sm:$0xff]   ;;  %v428_v27 = vld [vmem:[%s2315_s6 + $0x18] sm:$0xff]  ;;  %p2330_p12 = scmp.ne.s32.totalorder %s2324_s17, 0  ;;  %s1871_s23 = smov [#allocation6]  }
  0x45   : > { %s1506_s26 = sshll.u32 %s2037_s24, 5  ;;  %s1504_s10 = sshll.u32 %s2037_s24, 7  ;;  %v1651_v26 = vld [vmem:[%s2314_s5 + $0x30] sm:$0xff]   ;;  %v429_v29 = vld [vmem:[%s2315_s6 + $0x20] sm:$0xff]  ;;  %v1652_v31 = vld [vmem:[%s2314_s5 + $0x38] sm:$0xff]  }
  0x46   : > { %v430_v32 = vld [vmem:[%s2315_s6 + $0x28] sm:$0xff]  ;;  %v431_v34 = vld [vmem:[%s2315_s6 + $0x30] sm:$0xff]  ;;  %v432_v36 = vld [vmem:[%s2315_s6 + $0x38] sm:$0xff]  ;;  %s407_s13 = scalar_lea.vmem %s2313_s4, %s2037_s24 }
  0x47   : > { %s404_s20 = scalar_lea.vmem %s2328_s3, %s1506_s26  ;;  %v433_v38 = vld [vmem:[%s2315_s6 + $0x40] sm:$0xff]  ;;  %v434_v39 = vld [vmem:[%s2315_s6 + $0x48] sm:$0xff]  ;;  %v435_v40 = vld [vmem:[%s2315_s6 + $0x50] sm:$0xff]  ;;  %s1261_s3 = scalar_lea.sflag [#allocation7], %s2023_s22 }
  0x48   : > { %v1641_v2 = vld [vmem:[%s404_s20] sm:$0xff]   ;;  %v1642_v3 = vld [vmem:[%s404_s20 + $0x8] sm:$0xff]   ;;  %s2052_s19 = scalar_lea.vmem %s2329_s0, %s1504_s10  ;;  %v1643_v4 = vld [vmem:[%s404_s20 + $0x10] sm:$0xff]   ;;  %s1500_s0 = sshll.u32 %s1940_s9, 4 }
  0x49   : > { %1559 = vmatprep.subr.bf16.mxu0 %v1641_v2  ;;  %v441_v5 = vld [vmem:[%s2052_s19] sm:$0xff]  ;;  %v443_v6 = vld [vmem:[%s2052_s19 + $0x10] sm:$0xff]  ;;  %v442_v7 = vld [vmem:[%s2052_s19 + $0x8] sm:$0xff]  ;;  %s1771_s10 = sshll.u32 %s1871_s23, 4  ;;  %s1772_s10 = int_to_ptr.vmem [resolvable:$false] %s1771_s10 }
  0x4a   : > { %1560 = vmatpush3.bf16.msra.mxu0 %v1641_v2  ;;  %689 = vperm.xlu0 %1639, %v441_v5   ;;  %v1644_v8 = vld [vmem:[%s404_s20 + $0x18] sm:$0x7f]   ;;  %v445_v10 = vld [vmem:[%s2052_s19 + $0x20] sm:$0xff]  ;;  %v446_v12 = vld [vmem:[%s2052_s19 + $0x28] sm:$0xff]  ;;  %s1505_s20 = sshll.u32 %s2037_s24, 8  ;;  %s389_s24 = scalar_lea.vmem [#allocation6], %s2023_s22 }
  0x4b   : > { %1561 = vmatprep.subr.bf16.mxu0 %v1642_v3  ;;  %699 = vperm.xlu1 %1640, %v443_v6   ;;  %v444_v9 = vld [vmem:[%s2052_s19 + $0x18] sm:$0xff]  ;;  %v556_v11 = vsel %vm554_vm1, %v1644_v8, 0  ;;  %v447_v15 = vld [vmem:[%s2052_s19 + $0x30] sm:$0xff]  ;;  %v449_v17 = vld [vmem:[%s2052_s19 + $0x40] sm:$0xff]  ;;  %s2078_s26 = scalar_lea.vmem %s2310_s1, %s1505_s20  ;;  %s1287_s20 = sshll.u32 %s389_s24, 4  ;;  %s1288_s20 = int_to_ptr.vmem [resolvable:$true] %s1287_s20 }
  0x4c   : > { %v448_v16 = vld [vmem:[%s2052_s19 + $0x38] sm:$0xff]  ;;  %v450_v22 = vld [vmem:[%s2052_s19 + $0x48] sm:$0xff]  ;;  %v451_v24 = vld [vmem:[%s2052_s19 + $0x50] sm:$0xff]  ;;  %s1767_s21 = scalar_lea.vmem %s1288_s20, 16  ;;  %s1773_s12 = scalar_lea.vmem %s1772_s10, 32 }
  0x4d   : > { %v452_v28 = vld [vmem:[%s2052_s19 + $0x58] sm:$0xff]  ;;  %v453_v30 = vld [vmem:[%s2052_s19 + $0x60] sm:$0xff]  ;;  %v454_v33 = vld [vmem:[%s2052_s19 + $0x68] sm:$0xff]  ;;  %p1768_p6 = scmp.ne.s32.totalorder %s1288_s20, %s1767_s21  ;;  %p1774_p10 = scmp.lt.s32.totalorder %s1288_s20, %s1772_s10 }
  0x4e   : > { %1562 = vmatpush3.bf16.msra.mxu0 %v1642_v3  ;;  %694 = vperm.xlu0 %1639, %v442_v7   ;;  %v455_v35 = vld [vmem:[%s2052_s19 + $0x70] sm:$0xff]  ;;  %v456_v37 = vld [vmem:[%s2052_s19 + $0x78] sm:$0xff]  ;;  %v437_v42 = vld [vmem:[%s2315_s6 + $0x60] sm:$0xff]  ;;  %p1775_p0 = scmp.lt.s32.totalorder %s1773_s12, %s1767_s21 }
  0x4f   : > { %1563 = vmatprep.subr.bf16.mxu0 %v1643_v4  ;;  %704 = vperm.xlu1 %1640, %v444_v9   ;;  %v436_v41 = vld [vmem:[%s2315_s6 + $0x58] sm:$0xff]  ;;  %v438_v43 = vld [vmem:[%s2315_s6 + $0x68] sm:$0xff]  ;;  %v439_v44 = vld [vmem:[%s2315_s6 + $0x70] sm:$0xff]  ;;  %p1769_p13 = pnand %p1768_p6, %p2330_p12 }
  0x50   : > { %v440_v45 = vld [vmem:[%s2315_s6 + $0x78] sm:$0xff]  ;;  %v1540_v60 = vld [vmem:[%s2027_s25 + $0x8] sm:$0xff]   ;;  %v1509_v61 = vld [vmem:[%s2027_s25] sm:$0xff]   ;;  %p1776_p2 = por %p1775_p0, %p1774_p10 }
  0x51   : > { %v1514_v63 = vunpack.c.l.bf16 %v1540_v60  ;;  %v1511_v2 = vunpack.c.h.bf16 %v1509_v61  ;;  %v1515_v3 = vunpack.c.h.bf16 %v1540_v60  ;;  %v1542_v6 = vld [vmem:[%s2027_s25 + $0x18] sm:$0xff]   ;;  %v1541_v9 = vld [vmem:[%s2027_s25 + $0x10] sm:$0xff]   ;;  %p1770_p8 = pneg %p1769_p13 }
  0x52   : > { %1564 = vmatpush3.bf16.msra.mxu0 %v1643_v4  ;;  %709 = vperm.xlu0 %1639, %v445_v10  }
  0x53   : > { %1583 = vmatprep.subr.msk.bf16.mxu0 %vm554_vm1, %v1644_v8  ;;  %714 = vperm.xlu1 %1640, %v446_v12   ;;  %p1777_p4 = pnand %p1776_p2, %p1770_p8 }
  0x56   : > { %1566 = vmatpush3.bf16.msra.mxu0 %v556_v11  ;;  %719 = vperm.xlu0 %1639, %v447_v15  }
  0x57   : > { %724 = vperm.xlu1 %1640, %v448_v16  }
  0x59   : > { %1568 = vmatmul.mubr.msk.bf16.vlgmr.msra.gmra.mrb[0].mxu0 %vm529_vm0, %v1646_v13 }
  0x5a   : > { %1571 = vmatprep.mubr.msk.bf16.mxu0 %vm529_vm0, %v1647_v14  ;;  %729 = vperm.xlu0 %1639, %v449_v17   ;;  %v1522_v17 = vunpack.c.l.bf16 %v1542_v6 }
  0x5b   : > { %817 = vperm.xlu1 %1640, %v425_v18  }
  0x5e   : > { %822 = vperm.xlu0 %1639, %v426_v21  }
  0x5f   : > { %734 = vperm.xlu1 %1640, %v450_v22   ;;  %v1519_v22 = vunpack.c.h.bf16 %v1541_v9 }
  0x61   : > { %1572 = vmatmul.mubr.msk.bf16.gmra.mrb[4].mxu0 %vm529_vm0, %v1648_v19  ;;  %v1518_v19 = vunpack.c.l.bf16 %v1541_v9 }
  0x62   : > { %1575 = vmatprep.mubr.msk.bf16.mxu0 %vm529_vm0, %v1649_v20  ;;  %827 = vperm.xlu0 %1639, %v427_v23   ;;  %v1523_v23 = vunpack.c.h.bf16 %v1542_v6 }
  0x63   : > { %739 = vperm.xlu1 %1640, %v451_v24  }
  0x66   : > { %832 = vperm.xlu0 %1639, %v428_v27   ;;  %v1544_v27 = vld [vmem:[%s2027_s25 + $0x28] sm:$0xff]  }
  0x67   : > { %744 = vperm.xlu1 %1640, %v452_v28  }
  0x69   : > { %1576 = vmatmul.mubr.msk.bf16.gmra.mrb[8].mxu0 %vm529_vm0, %v1650_v25 }
  0x6a   : > { %1579 = vmatprep.mubr.msk.bf16.mxu0 %vm529_vm0, %v1651_v26  ;;  %837 = vperm.xlu0 %1639, %v429_v29  }
  0x6b   : > { %749 = vperm.xlu1 %1640, %v453_v30   ;;  %v1543_v30 = vld [vmem:[%s2027_s25 + $0x20] sm:$0xff]  }
  0x6e   : > { %842 = vperm.xlu0 %1639, %v430_v32  }
  0x6f   : > { %754 = vperm.xlu1 %1640, %v454_v33  }
  0x71   : > { %1580 = vmatmul.mubr.msk.bf16.gmra.mrb[12].mxu0 %vm529_vm0, %v1652_v31 }
  0x72   : > { %1211 = vmatprep.mubr.bf16.mxu0 %v1870_v0  ;;  %847 = vperm.xlu0 %1639, %v431_v34   ;;  %v1510_v0 = vunpack.c.l.bf16 %v1509_v61 }
  0x73   : > { %759 = vperm.xlu1 %1640, %v455_v35  }
  0x76   : > { %852 = vperm.xlu0 %1639, %v432_v36  }
  0x77   : > { %764 = vperm.xlu1 %1640, %v456_v37   ;;  %v1530_v37 = vunpack.c.l.bf16 %v1544_v27 }
  0x7a   : > { %857 = vperm.xlu0 %1639, %v433_v38  }
  0x7b   : > { %862 = vperm.xlu1 %1640, %v434_v39   ;;  %v1526_v39 = vunpack.c.l.bf16 %v1543_v30 }
  0x7e   : > { %867 = vperm.xlu0 %1639, %v435_v40  }
  0x7f   : > { %872 = vperm.xlu1 %1640, %v436_v41  }
  0x82   : > { %877 = vperm.xlu0 %1639, %v437_v42  }
  0x83   : > { %882 = vperm.xlu1 %1640, %v438_v43  }
  0x86   : > { %887 = vperm.xlu0 %1639, %v439_v44   ;;  %v1527_v44 = vunpack.c.h.bf16 %v1543_v30 }
  0x87   : > { %892 = vperm.xlu1 %1640, %v440_v45   ;;  %v1531_v45 = vunpack.c.h.bf16 %v1544_v27 }
  0xc9   : > { %v690_v46 = vpop.permute.xlu0 %689 }
  0xca   : > { %v700_v47 = vpop.permute.xlu1 %699  ;;  %v767_v5 = vadd.f32 %v1510_v0, %v690_v46 }
  0xcb   : > { %v769_v4 = vadd.f32 %v1514_v63, %v700_v47 }
  0xcd   : > { %v695_v48 = vpop.permute.xlu0 %694 }
  0xce   : > { %v705_v49 = vpop.permute.xlu1 %704  ;;  %v768_v12 = vadd.f32 %v1511_v2, %v695_v48 }
  0xcf   : > { %v770_v13 = vadd.f32 %v1515_v3, %v705_v49 }
  0xd1   : > { %v710_v50 = vpop.permute.xlu0 %709 }
  0xd2   : > { %v715_v51 = vpop.permute.xlu1 %714  ;;  %v771_v26 = vadd.f32 %v1518_v19, %v710_v50 }
  0xd3   : > { %v772_v33 = vadd.f32 %v1519_v22, %v715_v51  ;;  %v1546_v51 = vld [vmem:[%s2027_s25 + $0x38] sm:$0xff]  }
  0xd5   : > { %v720_v52 = vpop.permute.xlu0 %719 }
  0xd6   : > { %v725_v53 = vpop.permute.xlu1 %724  ;;  %v773_v25 = vadd.f32 %v1522_v17, %v720_v52 }
  0xd7   : > { %v774_v34 = vadd.f32 %v1523_v23, %v725_v53  ;;  %v1545_v53 = vld [vmem:[%s2027_s25 + $0x30] sm:$0xff]  }
  0xd9   : > { %v2153_v54 = vpop.permute.xlu0 %729 }
  0xda   : > { %v2155_v55 = vpop.permute.xlu1 %817  ;;  %v775_v50 = vadd.f32 %v1526_v39, %v2153_v54 }
  0xdd   : > { %v2157_v56 = vpop.permute.xlu0 %822 }
  0xde   : > { %v2159_v57 = vpop.permute.xlu1 %734 }
  0xdf   : > { %v776_v3 = vadd.f32 %v1527_v44, %v2159_v57 }
  0xe1   : > { %v2161_v58 = vpop.permute.xlu0 %827 }
  0xe2   : > { %v740_v59 = vpop.permute.xlu1 %739 }
  0xe3   : > { %v777_v48 = vadd.f32 %v1530_v37, %v740_v59 }
  0xe5   : > { %v2165_v62 = vpop.permute.xlu0 %832 }
  0xe6   : > { %v2167_v1 = vpop.permute.xlu1 %744 }
  0xe9   : > { %v2170_v7 = vpop.permute.xlu0 %837 }
  0xea   : > { %v2173_v14 = vpop.permute.xlu1 %749 }
  0xed   : > { %v2175_v24 = vpop.permute.xlu0 %842 }
  0xee   : > { %v2178_v28 = vpop.permute.xlu1 %754 }
  0xf1   : > { %v2181_v40 = vpop.permute.xlu0 %847 }
  0xf2   : > { %v760_v46 = vpop.permute.xlu1 %759 }
 0x12c   : > { %v1569_v8 = vpop.f32.mrb[0].mxu0 }
 0x12d   : > { %v785_v10 = vadd.f32 %v1569_v8, %v769_v4  ;;  %v592_v11 = vpop.f32.mrb[1].mxu0  ;;  %v778_v4 = vadd.f32 %v1531_v45, %v2167_v1  ;;  %v1538_v8 = vunpack.c.l.bf16 %v1546_v51  ;;  %v1539_v1 = vunpack.c.h.bf16 %v1546_v51 }
 0x12e   : > { %v783_v15 = vadd.f32 %v767_v5, %v592_v11  ;;  %v1570_v16 = vpop.f32.mrb[2].mxu0  ;;  %v853_v5 = vpop.permute.xlu0 %852  ;;  %v1534_v11 = vunpack.c.l.bf16 %v1545_v53 }
 0x12f   : > { %v595_v18 = vpop.f32.mrb[3].mxu0  ;;  %v786_v20 = vadd.f32 %v1570_v16, %v770_v13  ;;  %v1535_v16 = vunpack.c.h.bf16 %v1545_v53 }
 0x130   : > { %1701 = vtanh.f32 %v783_v15  ;;  %v784_v21 = vadd.f32 %v768_v12, %v595_v18  ;;  %v765_v12 = vpop.permute.xlu1 %764  ;;  %v781_v18 = vadd.f32 %v1538_v8, %v760_v46 }
 0x131   : > { %1703 = vtanh.f32 %v785_v10  ;;  %v780_v30 = vadd.f32 %v1535_v16, %v2178_v28 }
 0x132   : > { %1705 = vtanh.f32 %v784_v21  ;;  %v779_v21 = vadd.f32 %v1534_v11, %v2173_v14  ;;  %v858_v22 = vpop.permute.xlu0 %857 }
 0x133   : > { %1707 = vtanh.f32 %v786_v20 }
 0x134   : > { %v1573_v29 = vpop.f32.mrb[4].mxu0 }
 0x135   : > { %v789_v31 = vadd.f32 %v1573_v29, %v773_v25  ;;  %v608_v32 = vpop.f32.mrb[5].mxu0 }
 0x136   : > { %v787_v35 = vadd.f32 %v771_v26, %v608_v32  ;;  %v1574_v36 = vpop.f32.mrb[6].mxu0  ;;  %v863_v32 = vpop.permute.xlu1 %862 }
 0x137   : > { %v611_v38 = vpop.f32.mrb[7].mxu0  ;;  %v790_v41 = vadd.f32 %v1574_v36, %v774_v34 }
 0x138   : > { %1709 = vtanh.f32 %v787_v35  ;;  %v788_v42 = vadd.f32 %v772_v33, %v611_v38 }
 0x139   : > { %1711 = vtanh.f32 %v789_v31  ;;  %v782_v31 = vadd.f32 %v1539_v1, %v765_v12 }
 0x13a   : > { %v1702_v43 = vpop.eup %1701  ;;  %1713 = vtanh.f32 %v788_v42  ;;  %v873_v45 = vpop.permute.xlu1 %872 }
 0x13b   : > { %v1704_v47 = vpop.eup %1703  ;;  %1715 = vtanh.f32 %v790_v41  ;;  %v895_v60 = vmul.f32 %v1702_v43, %v2155_v55  ;;  %v868_v41 = vpop.permute.xlu0 %867 }
 0x13c   : > { %v1706_v49 = vpop.eup %1705  ;;  %v1577_v52 = vpop.f32.mrb[8].mxu0  ;;  %v897_v54 = vmul.f32 %v1704_v47, %v2161_v58 }
 0x13d   : > { %v896_v61 = vmul.f32 %v1706_v49, %v2157_v56  ;;  %v793_v63 = vadd.f32 %v1577_v52, %v777_v48  ;;  %v624_v0 = vpop.f32.mrb[9].mxu0  ;;  %v1708_v2 = vpop.eup %1707 }
 0x13e   : > { %v791_v59 = vadd.f32 %v775_v50, %v624_v0  ;;  %v1578_v6 = vpop.f32.mrb[10].mxu0  ;;  %v898_v13 = vmul.f32 %v1708_v2, %v2165_v62 }
 0x13f   : > { %v911_v9 = vadd.f32 %v896_v61, %v895_v60  ;;  %v627_v10 = vpop.f32.mrb[11].mxu0  ;;  %v794_v55 = vadd.f32 %v1578_v6, %v778_v4  ;;  %v878_v50 = vpop.permute.xlu0 %877 }
 0x140   : > { %1717 = vtanh.f32 %v791_v59  ;;  %v792_v56 = vadd.f32 %v776_v3, %v627_v10  ;;  %v883_v60 = vpop.permute.xlu1 %882 }
 0x141   : > { %v912_v15 = vadd.f32 %v911_v9, %v897_v54  ;;  %1719 = vtanh.f32 %v793_v63 }
 0x142   : > { %v1710_v57 = vpop.eup %1709  ;;  %1721 = vtanh.f32 %v792_v56 }
 0x143   : > { %v1712_v17 = vpop.eup %1711  ;;  %v899_v19 = vmul.f32 %v1710_v57, %v2170_v7  ;;  %v913_v58 = vadd.f32 %v912_v15, %v898_v13  ;;  %1723 = vtanh.f32 %v794_v55  ;;  %v888_v59 = vpop.permute.xlu0 %887  ;;  %v457_v57 = vld [vmem:[%s407_s13] sm:$0x1] }
 0x144   : > { %v1714_v20 = vpop.eup %1713  ;;  %v1581_v23 = vpop.f32.mrb[12].mxu0  ;;  %v901_v7 = vmul.f32 %v1712_v17, %v2181_v40 }
 0x145   : > { %v914_v25 = vadd.f32 %v913_v58, %v899_v19  ;;  %v900_v62 = vmul.f32 %v1714_v20, %v2175_v24  ;;  %v797_v26 = vadd.f32 %v1581_v23, %v781_v18  ;;  %v640_v27 = vpop.f32.mrb[13].mxu0  ;;  %v1716_v29 = vpop.eup %1715  ;;  %v1653_v18 = vld [vmem:[%s2078_s26 + $0x8] ss:$16 sps:$4 sm:$0xff]   ;;  %v1655_v19 = vld [vmem:[%s2078_s26 + $0xc] ss:$16 sps:$4 sm:$0xff]  }
 0x146   : > { %v795_v33 = vadd.f32 %v779_v21, %v640_v27  ;;  %v1582_v34 = vpop.f32.mrb[14].mxu0  ;;  %v902_v38 = vmul.f32 %v1716_v29, %v853_v5  ;;  %v893_v54 = vpop.permute.xlu1 %892  ;;  %v1656_v58 = vld [vmem:[%s2078_s26 + $0x4] ss:$16 sps:$4 sm:$0xff]   ;;  %v1658_v20 = vld [vmem:[%s2078_s26] ss:$16 sps:$4 sm:$0xff]   ;;  %1179 = vmatprep.subr.bf16.mxu0 %v1655_v19 }
 0x147   : > { %v915_v35 = vadd.f32 %v914_v25, %v900_v62  ;;  %v643_v36 = vpop.f32.mrb[15].mxu0  ;;  %v798_v14 = vadd.f32 %v1582_v34, %v782_v31  ;;  %v1661_v21 = vld [vmem:[%s2078_s26 + $0x2c] ss:$16 sps:$4 sm:$0xff]   ;;  %1138 = vmatprep.subr.bf16.mxu1 %v1656_v58  ;;  %1180 = vmatpush1.bf16.msra.mxu0 %v1653_v18  ;;  %v1659_v23 = vld [vmem:[%s2078_s26 + $0x28] ss:$16 sps:$4 sm:$0xff]  }
 0x148   : > { %1725 = vtanh.f32 %v795_v33  ;;  %v796_v37 = vadd.f32 %v780_v30, %v643_v36  ;;  %1139 = vmatpush1.bf16.msra.mxu1 %v1658_v20  ;;  %v1664_v25 = vld [vmem:[%s2078_s26 + $0x20] ss:$16 sps:$4 sm:$0xff]   ;;  %1181 = vmatprep.subr.bf16.mxu0 %v1661_v21  ;;  %v1667_v62 = vld [vmem:[%s2078_s26 + $0x4c] ss:$16 sps:$4 sm:$0xff]   ;;  %v1665_v27 = vld [vmem:[%s2078_s26 + $0x48] ss:$16 sps:$4 sm:$0xff]  }
 0x149   : > { %v916_v39 = vadd.f32 %v915_v35, %v901_v7  ;;  %1727 = vtanh.f32 %v797_v26  ;;  %v1668_v26 = vld [vmem:[%s2078_s26 + $0x44] ss:$16 sps:$4 sm:$0xff]   ;;  %v1670_v29 = vld [vmem:[%s2078_s26 + $0x40] ss:$16 sps:$4 sm:$0xff]   ;;  %v1673_v30 = vld [vmem:[%s2078_s26 + $0x6c] ss:$16 sps:$4 sm:$0xff]  }
 0x14a   : > { %v1718_v24 = vpop.eup %1717  ;;  %1729 = vtanh.f32 %v796_v37  ;;  %v1674_v31 = vld [vmem:[%s2078_s26 + $0x64] ss:$16 sps:$4 sm:$0xff]   ;;  %v1676_v33 = vld [vmem:[%s2078_s26 + $0x60] ss:$16 sps:$4 sm:$0xff]   ;;  %v1679_v34 = vld [vmem:[%s2078_s26 + $0x8c] ss:$16 sps:$4 sm:$0xff]  }
 0x14b   : > { %v1720_v42 = vpop.eup %1719  ;;  %v903_v43 = vmul.f32 %v1718_v24, %v858_v22  ;;  %v917_v28 = vadd.f32 %v916_v39, %v902_v38  ;;  %1731 = vtanh.f32 %v798_v14  ;;  %v1662_v22 = vld [vmem:[%s2078_s26 + $0x24] ss:$16 sps:$4 sm:$0xff]   ;;  %1182 = vmatpush1.bf16.msra.mxu0 %v1659_v23  ;;  %v1677_v35 = vld [vmem:[%s2078_s26 + $0x88] ss:$16 sps:$4 sm:$0xff]   ;;  %v1682_v24 = vld [vmem:[%s2078_s26 + $0x80] ss:$16 sps:$4 sm:$0xff]  }
 0x14c   : > { %v1722_v44 = vpop.eup %1721  ;;  %v905_v48 = vmul.f32 %v1720_v42, %v868_v41  ;;  %1140 = vmatprep.subr.bf16.mxu1 %v1662_v22  ;;  %1183 = vmatprep.subr.bf16.mxu0 %v1667_v62  ;;  %v1680_v7 = vld [vmem:[%s2078_s26 + $0x84] ss:$16 sps:$4 sm:$0xff]   ;;  %v1683_v41 = vld [vmem:[%s2078_s26 + $0xa8] ss:$16 sps:$4 sm:$0xff]   ;;  %v1685_v42 = vld [vmem:[%s2078_s26 + $0xac] ss:$16 sps:$4 sm:$0xff]  }
 0x14d   : > { %v918_v46 = vadd.f32 %v917_v28, %v903_v43  ;;  %v904_v47 = vmul.f32 %v1722_v44, %v863_v32  ;;  %v1724_v40 = vpop.eup %1723  ;;  %1141 = vmatpush1.bf16.msra.mxu1 %v1664_v25  ;;  %v1671_v32 = vld [vmem:[%s2078_s26 + $0x68] ss:$16 sps:$4 sm:$0xff]   ;;  %v1686_v43 = vld [vmem:[%s2078_s26 + $0xa4] ss:$16 sps:$4 sm:$0xff]   ;;  %v1688_v28 = vld [vmem:[%s2078_s26 + $0xa0] ss:$16 sps:$4 sm:$0xff]  }
 0x14e   : > { %v906_v51 = vmul.f32 %v1724_v40, %v873_v45  ;;  %1142 = vmatprep.subr.bf16.mxu1 %v1668_v26  ;;  %v1691_v44 = vld [vmem:[%s2078_s26 + $0xcc] ss:$16 sps:$4 sm:$0xff]   ;;  %v1692_v45 = vld [vmem:[%s2078_s26 + $0xc4] ss:$16 sps:$4 sm:$0xff]  }
 0x14f   : > { %v919_v49 = vadd.f32 %v918_v46, %v904_v47  ;;  %1184 = vmatpush1.bf16.msra.mxu0 %v1665_v27  ;;  %v1689_v46 = vld [vmem:[%s2078_s26 + $0xc8] ss:$16 sps:$4 sm:$0xff]   ;;  %v1694_v47 = vld [vmem:[%s2078_s26 + $0xc0] ss:$16 sps:$4 sm:$0xff]   ;;  %v1697_v40 = vld [vmem:[%s2078_s26 + $0xec] ss:$16 sps:$4 sm:$0xff]  }
 0x150   : > { %1185 = vmatprep.subr.bf16.mxu0 %v1673_v30 }
 0x151   : > { %v920_v52 = vadd.f32 %v919_v49, %v905_v48  ;;  %1143 = vmatpush1.bf16.msra.mxu1 %v1670_v29  ;;  %v1698_v48 = vld [vmem:[%s2078_s26 + $0xe4] ss:$16 sps:$4 sm:$0xff]   ;;  %v1695_v49 = vld [vmem:[%s2078_s26 + $0xe8] ss:$16 sps:$4 sm:$0xff]  }
 0x152   : > { %v1726_v53 = vpop.eup %1725  ;;  %1144 = vmatprep.subr.bf16.mxu1 %v1674_v31 }
 0x153   : > { %v1728_v61 = vpop.eup %1727  ;;  %v907_v63 = vmul.f32 %v1726_v53, %v878_v50  ;;  %v921_v0 = vadd.f32 %v920_v52, %v906_v51  ;;  %1186 = vmatpush1.bf16.msra.mxu0 %v1671_v32  ;;  %v1700_v50 = vld [vmem:[%s2078_s26 + $0xe0] ss:$16 sps:$4 sm:$0xff]   ;;  %s2240_s26 = scalar_lea.hbm %s2317_s8, %s1500_s0 }
 0x154   : > { %v1730_v2 = vpop.eup %1729  ;;  %v909_v6 = vmul.f32 %v1728_v61, %v888_v59  ;;  %1187 = vmatprep.subr.bf16.mxu0 %v1679_v34 }
 0x155   : > { %v922_v3 = vadd.f32 %v921_v0, %v907_v63  ;;  %v908_v4 = vmul.f32 %v1730_v2, %v883_v60  ;;  %v1732_v5 = vpop.eup %1731  ;;  %1145 = vmatpush1.bf16.msra.mxu1 %v1676_v33 }
 0x156   : > { %v910_v9 = vmul.f32 %v1732_v5, %v893_v54  ;;  %1146 = vmatprep.subr.bf16.mxu1 %v1680_v7 }
 0x157   : > { %v923_v8 = vadd.f32 %v922_v3, %v908_v4  ;;  %1188 = vmatpush1.bf16.msra.mxu0 %v1677_v35 }
 0x158   : > { %1189 = vmatprep.subr.bf16.mxu0 %v1685_v42 }
 0x159   : > { %v924_v10 = vadd.f32 %v923_v8, %v909_v6  ;;  %1147 = vmatpush1.bf16.msra.mxu1 %v1682_v24 }
 0x15a   : > { %1148 = vmatprep.subr.bf16.mxu1 %v1686_v43 }
 0x15b   : > { %v925_v11 = vadd.f32 %v924_v10, %v910_v9  ;;  %1190 = vmatpush1.bf16.msra.mxu0 %v1683_v41 }
 0x15c   : > { %1191 = vmatprep.subr.bf16.mxu0 %v1691_v44 }
 0x15d   : > { %v926_v12 = vrot.slane %v925_v11, 4  ;;  %1149 = vmatpush1.bf16.msra.mxu1 %v1688_v28 }
 0x15e   : > { %1150 = vmatprep.subr.bf16.mxu1 %v1692_v45 }
 0x15f   : > { %v927_v55 = vadd.f32 %v926_v12, %v925_v11  ;;  %1192 = vmatpush1.bf16.msra.mxu0 %v1689_v46 }
 0x160   : > { %1193 = vmatprep.subr.bf16.mxu0 %v1697_v40 }
 0x161   : > { %v928_v56 = vrot.slane %v927_v55, 2  ;;  %1151 = vmatpush1.bf16.msra.mxu1 %v1694_v47 }
 0x162   : > { %1152 = vmatprep.subr.bf16.mxu1 %v1698_v48 }
 0x163   : > { %v929_v13 = vadd.f32 %v928_v56, %v927_v55  ;;  %1194 = vmatpush1.bf16.msra.mxu0 %v1695_v49 }
 0x165   : > { %v930_v15 = vrot.slane %v929_v13, 1  ;;  %1153 = vmatpush1.bf16.msra.mxu1 %v1700_v50 }
 0x167   : > { %v931_v16 = vadd.f32 %v930_v15, %v929_v13 }
 0x169   : > { %v932_v1 = vadd.f32 %v931_v16, %v457_v57 }
 0x16b   : > { %v934_v17 = vsel %vm933_vm2, %v932_v1, -inf }
 0x16c   : > { %935 = vmax.xlane.f32.xlu0 %v934_v17 }
 0x1f9   : > { %v936_v36 = vpop.xlane.xlu0 %935 }
 0x1fa   : > { %v937_v14 = vsub.f32 %v932_v1, %v936_v36 }
 0x1fc   : > { %v938_v37 = vmul.f32 1.442695, %v937_v14 }
 0x1fe   : > { %1733 = vpow2.f32 %v938_v37 }
 0x208   : > { %v1734_v38 = vpop.eup %1733 }
 0x209   : > { %v940_v39 = vsel %vm933_vm2, %v1734_v38, 0.0 }
 0x20a   : > { %941 = vadd.xlane.f32.xlu1 %v940_v39 }
 0x297   : > { %v942_v51 = vpop.xlane.xlu1 %941 }
 0x298   : > { %1735 = vrcp.f32 %v942_v51 }
 0x2a2   : > { %v1736_v52 = vpop.eup %1735 }
 0x2a3   : > { %v944_v53 = vmul.f32 %v1736_v52, %v1734_v38 }
 0x2a5   : > { %v945_v60 = vpack.c.bf16 %v944_v53, %v944_v53  ;;  %1254 = vst [vmem:[%s389_s24] sm:$0x1] %v944_v53 }
 0x2a7   : > { %1171 = vmatmul.mubr.bf16.vlgmr.msra.gmra.mrb[0].mxu1 %v945_v60  ;;  %1212 = vmatmul.mubr.bf16.vlgmr.msra.gmra.mrb[16].mxu0 %v945_v60 }
 0x2a8   : > { %1780 = shalt.err (!%p1777_p4)
}
 0x2a9   : > { %s1781_s16 = scalar_lea.hbm %s2240_s26, 16  ;;  %s1785_s13 = scalar_lea.hbm %s2317_s8, 32 }
 0x2aa   : > { %p1782_p5 = scmp.ne.s32.totalorder %s2240_s26, %s1781_s16  ;;  %p1786_p1 = scmp.lt.u32.totalorder %s2240_s26, %s2317_s8 }
 0x2ab   : > { %p1787_p3 = scmp.lt.u32.totalorder %s1785_s13, %s1781_s16  ;;  %p1789_p6 = scmp.lt.u32.totalorder %s1781_s16, %s2240_s26 }
 0x2ac   : > { %p1783_p7 = pnand %p1782_p5, %p2330_p12 }
 0x2ad   : > { %p1788_p11 = por %p1787_p3, %p1786_p1 }
 0x2ae   : > { %p1784_p9 = pneg %p1783_p7 }
 0x2af   : > { %p1790_p13 = por %p1789_p6, %p1788_p11 }
 0x2b1   : > { %p1791_p8 = pnand %p1790_p13, %p1784_p9 }
 0x2b3   : > { %1794 = shalt.err (!%p1791_p8)
}
 0x2b4   : > { %1587 = dma.vmem_to_hbm [thread:$0]  (%p2330_p12), %s1288_s20, 16, %s2240_s26, %s1261_s3   ;;  %v1872_v61 = vmov 1966171168   ;;  %v1229_v0 = vlaneseq }
 0x2b5   : > { %v1227_v63 = vunpack.c.l.s4 %v1872_v61  ;;  %s1438_s19 = sshll.u32 %s2023_s22, 2  ;;  %s1507_s20 = sshll.u32 %s1940_s9, 6 }
 0x2b6   : > { %v1230_v3 = vshrl.u32 %v1229_v0, 7  ;;  %s383_s2 = scalar_lea.vmem [#allocation5], %s1438_s19  ;;  %vm1251_vm3 = vcmp.lt.s32.totalorder %v1229_v0, 512  ;;  %s2265_s23 = scalar_lea.hbm %s2316_s7, %s1507_s20 }
 0x2b7   : > { %v1228_v2 = vunpack.c.0.s8 %v1227_v63  ;;  %s1274_s26 = sshll.u32 %s383_s2, 4  ;;  %s1256_s10 = scalar_lea.sflag [#allocation4], %s2023_s22  ;;  %s2267_s26 = int_to_ptr.vmem [resolvable:$true] %s1274_s26 }
 0x2b8   : > { %s1795_s12 = scalar_lea.vmem %s2267_s26, 64  ;;  %s1873_s9 = smov [#allocation5]  }
 0x2b9   : > { %v1231_v59 = vsub.s32 %v1228_v2, %v1230_v3  ;;  %p1796_p10 = scmp.ne.s32.totalorder %s2267_s26, %s1795_s12  ;;  %s1799_s16 = sshll.u32 %s1873_s9, 4  ;;  %s1800_s16 = int_to_ptr.vmem [resolvable:$false] %s1799_s16 }
 0x2ba   : > { %s1801_s25 = scalar_lea.vmem %s1800_s16, 128  ;;  %p1802_p4 = scmp.lt.s32.totalorder %s2267_s26, %s1800_s16 }
 0x2bb   : > { %p1797_p0 = pnand %p1796_p10, %p2330_p12  ;;  %p1803_p5 = scmp.lt.s32.totalorder %s1801_s25, %s1795_s12 }
 0x2bd   : > { %p1798_p2 = pneg %p1797_p0  ;;  %p1804_p7 = por %p1803_p5, %p1802_p4 }
 0x2bf   : > { %p1805_p9 = pnand %p1804_p7, %p1798_p2 }
 0x37a   : > { %v1172_v4 = vpop.f32.mrb[0].mxu1  ;;  %v1213_v5 = vpop.f32.mrb[16].mxu0 }
 0x37b   : > { %v1174_v6 = vpop.f32.mrb[1].mxu1  ;;  %v1215_v8 = vpop.f32.mrb[17].mxu0 }
 0x37c   : > { %v1224_v54 = vcombine.low %v1172_v4, %v1174_v6  ;;  %v1225_v9 = vcombine.low %v1213_v5, %v1215_v8  ;;  %v1176_v10 = vpop.f32.mrb[2].mxu1  ;;  %v1217_v11 = vpop.f32.mrb[18].mxu0 }
 0x37d   : > { %v1177_v12 = vpop.f32.mrb[3].mxu1  ;;  %v1218_v55 = vpop.f32.mrb[19].mxu0 }
 0x37e   : > { %v1232_v56 = vrot.slane %v1224_v54, %v1231_v59  ;;  %v1239_v13 = vrot.slane %v1225_v9, %v1231_v59 }
 0x380   : > { %v1240_v15 = vcombine.low %v1232_v56, %v1239_v13 }
 0x382   : > { %v1247_v57 = vrot.slane %v1240_v15, %v1231_v59 }
 0x384   : > { %1253 = vst.msk [vmem:[%s383_s2] sm:$0xf] %vm1251_vm3, %v1247_v57 }
 0x385   : > { %1808 = shalt.err (!%p1805_p9)
}
 0x386   : > { %s1809_s22 = scalar_lea.hbm %s2265_s23, 64  ;;  %s1813_s24 = scalar_lea.hbm %s2316_s7, 128 }
 0x387   : > { %p1810_p1 = scmp.ne.s32.totalorder %s2265_s23, %s1809_s22  ;;  %p1814_p6 = scmp.lt.u32.totalorder %s2265_s23, %s2316_s7 }
 0x388   : > { %p1815_p13 = scmp.lt.u32.totalorder %s1813_s24, %s1809_s22  ;;  %p1817_p10 = scmp.lt.u32.totalorder %s1809_s22, %s2265_s23 }
 0x389   : > { %p1811_p3 = pnand %p1810_p1, %p2330_p12 }
 0x38a   : > { %p1816_p8 = por %p1815_p13, %p1814_p6 }
 0x38b   : > { %p1812_p11 = pneg %p1811_p3 }
 0x38c   : > { %p1818_p0 = por %p1817_p10, %p1816_p8 }
 0x38e   : > { %p1819_p2 = pnand %p1818_p0, %p1812_p11 }
 0x390   : > { %1822 = shalt.err (!%p1819_p2)
}
 0x391   : > { %1586 = dma.vmem_to_hbm [thread:$0]  (%p2330_p12), %s2267_s26, 64, %s2265_s23, %s1256_s10  }
 0x392 PF: > { %s1299_s20 = sand.u32 1, %s1853_s27   ;;  %p2331_p4 = scmp.ne.s32.totalorder %s2325_s18, 0 }
 0x393   : > { %p2332_p5 = scmp.ge.s32.totalorder %s1865_s30, 2  ;;  %s1300_s2 = scalar_lea.sflag [#allocation4], %s1299_s20 }
 0x395   : > { %p1595_p7 = pnand %p2332_p5, %p2331_p4 }
 0x397   : > { %1844 = dma.done.wait (!%p1595_p7), %s1300_s2, 64  }
 0x398   : > { %1846 = vsyncadd (!%p1595_p7), %s1300_s2, 4294967232  ;;  %s1309_s3 = scalar_lea.sflag [#allocation7], %s1299_s20 }
 0x399   : > { %1848 = dma.done.wait (!%p1595_p7), %s1309_s3, 16  }
 0x39a   : > { %1850 = vsyncadd (!%p1595_p7), %s1309_s3, 4294967280  ;;  %p25_p12 = scmp.ge.s32.totalorder %s1944_s11, 4   ;;  %s2333_s27 = smov %s1857_s28 }
 0x39b   : > { %s2334_s28 = smov %s1861_s29  ;;  %s2335_s29 = smov %s1956_s14 }
 0x39c   : > { %s2336_s30 = smov %s1944_s11  ;;  %27 = sbr.rel (!%p25_p12) target bundleno = 11 (0xb), region = 122 }
 0x3a3   :  { %1313 = vsyncpa [#allocation3], 1 }
 0x3a4   :  { %1315 = vsyncpa [#allocation3 + $0x1], 1 }
 0x3a5   :  { %1316 = vsyncpa [#allocation4], 1 }
 0x3a6   :  { %1318 = vsyncpa [#allocation4 + $0x1], 1 }
 0x3a7   :  { %1319 = vsyncpa [#allocation7], 1 }
 0x3a8   :  { %1321 = vsyncpa [#allocation7 + $0x1], 1 }

</bundles_post_ra>
